<compile_context>
chip_gen: v7x
topology: tpu7x:2x2x1
jax: 0.10.0
libtpu: 0.0.40
codegen_flags: <defaults>
</compile_context>

<pallas_src>
import jax
import jax.numpy as jnp
from jax.experimental import pallas as pl
from jax.experimental.pallas import tpu as pltpu

# ---- small hyper-parameters consistent with the module ----
VOCAB = 50
BATCH = 2
SEQ = 8              # padded token length fed to "BERT"
BERT_DIM = 32        # opt.bert_dim
HID = 2 * BERT_DIM   # NoQueryAttention embed_dim = hidden_dim = 2*bert_dim
POL = 3              # opt.polarities_dim

# ---- packed parameter slab layout (all blocks padded to 128 lanes) ----
D_PAD = 128
R_BW = 0                      # bert_w   [D, D]   rows  0:32
R_DW = R_BW + BERT_DIM        # dense_w  [D, P]   rows 32:64
R_VEC = R_DW + BERT_DIM       # 8 vector rows: bert_b, dense_b, v_x, v_a, c0, pad
SLAB_ROWS = R_VEC + 8         # 72 (multiple of 8 sublanes)


def atae_kernel(lens_ref, emb_ref, slab_ref, out_ref):
    # lens_ref : SMEM int32 [2B+1]  = x_len[0:B], aspect_len[0:B], batch_max_len
    # emb_ref  : VMEM bf16  [B*2L, D]  (per example: L text rows then L aspect rows)
    # slab_ref : VMEM bf16  [SLAB_ROWS, 128]
    # out_ref  : VMEM f32   [B, 128]
    R, D = emb_ref.shape
    B = out_ref.shape[0]
    L = R // (2 * B)

    # ---- static views into the packed parameter slab ----
    bert_w = slab_ref[pl.ds(R_BW, D), :]                          # [D, 128] bf16
    dense_w = slab_ref[pl.ds(R_DW, D), :].astype(jnp.float32)     # [D, 128] f32
    vecs = slab_ref[pl.ds(R_VEC, 8), :].astype(jnp.float32)       # [8, 128]
    bert_b, dense_b, v_x, v_a = vecs[0:1], vecs[1:2], vecs[2:3], vecs[3:4]
    c0 = vecs[4:5, 0:1]                                           # [1, 1]  bk . qw

    # ---- synthetic BERT projection: one fused matmul for all text+aspect tokens ----
    # TODO(synk): stand-in for the external pretrained BERT encoder.
    h = jnp.tanh(jnp.dot(emb_ref[...], bert_w,
                         preferred_element_type=jnp.float32) + bert_b)      # [B*2L, 128] f32

    pos = jax.lax.broadcasted_iota(jnp.int32, (L, 1), 0)           # [L, 1]
    keep_l = pos < lens_ref[2 * B]                                 # positions past batch max

    rs = []
    for b in range(B):                       # B is tiny and static -> unrolled
        x = h[2 * b * L: 2 * b * L + L, :]                         # [L, 128] text states
        av = h[2 * b * L + L: 2 * (b + 1) * L, :]                  # [L, 128] aspect states

        keep_x = (pos < lens_ref[b]).astype(jnp.float32)           # this example's text len
        keep_a = (pos < lens_ref[B + b]).astype(jnp.float32)       # this example's aspect len

        # SqueezeEmbedding: zero text states past this example's length (dropout = identity).
        x = x * keep_x

        # Aspect mean-pool: sum over full padded length / (# non-pad aspect tokens).
        alen = jnp.sum(keep_a, axis=0, keepdims=True)                            # [1, 1]
        asp_pool = (jnp.sum(av, axis=0, keepdims=True)
                    * pl.reciprocal(alen, approx=True))                          # [1, 128]

        # NoQueryAttention (bi_linear) with the query folded into the key weights,
        # all batch-invariant pieces (v_x, v_a, c0) precomputed outside the kernel:
        #   logits[l] = x[l] . v_x + asp_pool . v_a + bk . qw
        c = jnp.sum(asp_pool * v_a, axis=1, keepdims=True) + c0                  # [1, 1]
        logits = jnp.sum(x * v_x, axis=1, keepdims=True) + c                     # [L, 1]
        # Positions beyond the batch-wide max text length do not exist in the torch graph.
        logits = jnp.where(keep_l, logits, -1e30)

        # Softmax over key positions (L lives on sublanes -> sublane reductions).
        mx = jnp.max(logits, axis=0, keepdims=True)
        e = jnp.exp(logits - mx)
        score = e * pl.reciprocal(jnp.sum(e, axis=0, keepdims=True), approx=True)

        # r = squeeze(bmm(score, x))
        rs.append(jnp.sum(x * score, axis=0, keepdims=True))                     # [1, 128]

    r = jnp.concatenate(rs, axis=0)                                              # [B, 128]
    out = jnp.dot(r[:, :D], dense_w, preferred_element_type=jnp.float32) + dense_b
    out_ref[...] = out.astype(out_ref.dtype)


def build_param_slab(params):
    """Pack weights + precomputed batch-invariant attention vectors into one
    [72, 128] bf16 slab (zero padded).  Runs in XLA, f32 math."""
    q16 = lambda a: jnp.asarray(a, jnp.float32).astype(jnp.bfloat16).astype(jnp.float32)
    bert_w, bert_b = q16(params["bert_w"]), q16(params["bert_b"])
    wk, bk = q16(params["wk"]), q16(params["bk"])
    q, wq, bq = q16(params["q"]), q16(params["wq"]), q16(params["bq"])
    bl = q16(params["bl"])
    dense_w, dense_b = q16(params["dense_w"]), q16(params["dense_b"])

    # Batch-invariant attention precompute (was 4 MXU matmuls per grid step before):
    #   qw = (q@Wq+bq)@Wbl ; u = Wk@qw ; logits = x.u[:D] + asp_pool.u[D:] + bk.qw
    qx = q @ wq + bq                      # [1, H]
    qw = (qx @ bl)[0]                     # [H]
    u = wk @ qw                           # [2D]
    v_x, v_a = u[:BERT_DIM], u[BERT_DIM:]
    c0 = jnp.dot(bk, qw)                  # scalar

    def pad_rows(a, rows):
        blk = jnp.zeros((rows, D_PAD), jnp.float32)
        return blk.at[:a.shape[0], :a.shape[1]].set(a)

    vec = jnp.zeros((8, D_PAD), jnp.float32)
    vec = vec.at[0, :BERT_DIM].set(bert_b)
    vec = vec.at[1, :POL].set(dense_b)
    vec = vec.at[2, :BERT_DIM].set(v_x)
    vec = vec.at[3, :BERT_DIM].set(v_a)
    vec = vec.at[4, 0].set(c0)

    slab = jnp.concatenate([
        pad_rows(bert_w, BERT_DIM),
        pad_rows(dense_w, BERT_DIM),
        vec,
    ], axis=0)
    assert slab.shape == (SLAB_ROWS, D_PAD)
    return slab.astype(jnp.bfloat16)


def atae_bert_forward(params, text_ids, aspect_ids):
    B, L = text_ids.shape
    # --- XLA glue: embedding gather, length scalars, parameter packing (no host syncs) ---
    text_emb = params["emb"][text_ids].astype(jnp.bfloat16)      # [B, L, D]
    asp_emb = params["emb"][aspect_ids].astype(jnp.bfloat16)     # [B, L, D]
    # per example: L text rows followed by L aspect rows -> one [B*2L, D] matmul lhs
    emb_all = jnp.concatenate([text_emb, asp_emb], axis=1).reshape(B * 2 * L, BERT_DIM)

    x_len = jnp.sum(text_ids != 0, axis=-1).astype(jnp.int32)    # [B]
    a_len = jnp.sum(aspect_ids != 0, axis=-1).astype(jnp.int32)  # [B]
    lens = jnp.concatenate([x_len, a_len, jnp.max(x_len, keepdims=True)]).astype(jnp.int32)

    slab = build_param_slab(params)                              # [72, 128] bf16

    out = pl.pallas_call(
        atae_kernel,
        out_shape=jax.ShapeDtypeStruct((B, D_PAD), jnp.float32),
        in_specs=[
            pl.BlockSpec(memory_space=pltpu.MemorySpace.SMEM),   # lengths (scalars)
            pl.BlockSpec(memory_space=pltpu.MemorySpace.VMEM),   # stacked embeddings
            pl.BlockSpec(memory_space=pltpu.MemorySpace.VMEM),   # parameter slab
        ],
        out_specs=pl.BlockSpec(memory_space=pltpu.MemorySpace.VMEM),
    )(lens, emb_all, slab)
    return out[:, :POL]


# ------------------------- pure-JAX reference (for the check) -------------------------
def synthetic_bert(params, ids):
    # TODO(synk): stand-in for the external pretrained BERT encoder (embedding + tanh proj).
    h = params["emb"][ids]
    h = jnp.tanh(h @ params["bert_w"] + params["bert_b"])
    return h, None


def reference_forward(params, text_ids, aspect_ids):
    # Mirrors the PyTorch forward (eval mode) with static SEQ + masking.
    x_len = jnp.sum(text_ids != 0, axis=-1)
    aspect_len = jnp.sum(aspect_ids != 0, axis=-1).astype(jnp.float32)
    x, _ = synthetic_bert(params, text_ids)                     # [B, SEQ, D]
    aspect, _ = synthetic_bert(params, aspect_ids)
    pos = jnp.arange(SEQ)[None, :]
    x = x * (pos < x_len[:, None]).astype(x.dtype)[:, :, None]  # SqueezeEmbedding zeroing
    aspect_pool = jnp.sum(aspect, axis=1) / aspect_len[:, None]
    asp_exp = jnp.broadcast_to(aspect_pool[:, None, :], (x.shape[0], SEQ, BERT_DIM))
    ha = jnp.concatenate([x, asp_exp], axis=-1)
    kx = ha @ params["wk"] + params["bk"]
    qx = params["q"] @ params["wq"] + params["bq"]
    qw = (qx @ params["bl"])[0]                                 # [H]
    logits = jnp.einsum('blh,h->bl', kx, qw)
    # positions beyond the batch-wide max text length don't exist in the torch graph
    logits = jnp.where(pos < jnp.max(x_len), logits, -1e30)
    score = jax.nn.softmax(logits, axis=-1)
    r = jnp.einsum('bl,bld->bd', score, x)
    return r @ params["dense_w"] + params["dense_b"]


def init_params(key):
    keys = jax.random.split(key, 10)
    s = 0.1
    return {
        "emb": jax.random.normal(keys[0], (VOCAB, BERT_DIM), jnp.float32) * s,
        "bert_w": jax.random.normal(keys[1], (BERT_DIM, BERT_DIM), jnp.float32) * s,
        "bert_b": jax.random.normal(keys[2], (BERT_DIM,), jnp.float32) * s,
        "wk": jax.random.normal(keys[3], (HID, HID), jnp.float32) * s,   # [2D, H]
        "bk": jax.random.normal(keys[4], (HID,), jnp.float32) * s,
        "q": jax.random.normal(keys[5], (1, HID), jnp.float32) * s,      # NoQueryAttention q
        "wq": jax.random.normal(keys[6], (HID, HID), jnp.float32) * s,   # [2D, H]
        "bq": jax.random.normal(keys[7], (HID,), jnp.float32) * s,
        "bl": jax.random.normal(keys[8], (HID, HID), jnp.float32) * s,   # bi_linear weight
        "dense_w": jax.random.normal(keys[9], (BERT_DIM, POL), jnp.float32) * s,
        "dense_b": jnp.zeros((POL,), jnp.float32),
    }


if __name__ == "__main__":
    key = jax.random.PRNGKey(0)
    pkey, tkey, akey = jax.random.split(key, 3)
    params = init_params(pkey)

    # deterministic padded token ids (padding token = 0)
    text_len = jnp.array([6, 4])
    asp_len = jnp.array([3, 2])
    pos = jnp.arange(SEQ)[None, :]
    text_ids = jax.random.randint(tkey, (BATCH, SEQ), 1, VOCAB)
    aspect_ids = jax.random.randint(akey, (BATCH, SEQ), 1, VOCAB)
    text_ids = jnp.where(pos < text_len[:, None], text_ids, 0).astype(jnp.int32)
    aspect_ids = jnp.where(pos < asp_len[:, None], aspect_ids, 0).astype(jnp.int32)

    # fully jit-able (no host-side max)
    fwd = jax.jit(atae_bert_forward)
    out = jax.block_until_ready(fwd(params, text_ids, aspect_ids))

    # reference on bf16-quantized parameters (kernel quantizes inputs/weights to bf16);
    # tolerance also covers the approx EUP reciprocals used in the kernel.
    q16 = lambda a: a.astype(jnp.bfloat16).astype(jnp.float32)
    params_q = jax.tree_util.tree_map(q16, params)
    ref = reference_forward(params_q, text_ids, aspect_ids)

    assert out.shape == (BATCH, POL)
    assert jnp.allclose(out, ref, rtol=1e-3, atol=1e-3), (out, ref)
    print("KERNEL_OK")
</pallas_src>

<mosaic_0001>
module attributes {stable_mosaic.version = 11 : i64} {
  func.func @atae_kernel(%arg0: memref<5xi32, #tpu.memory_space<smem>>, %arg1: memref<32x32xbf16, #tpu.memory_space<vmem>>, %arg2: memref<72x128xbf16, #tpu.memory_space<vmem>>, %arg3: memref<2x128xf32, #tpu.memory_space<vmem>>) attributes {dimension_semantics = [], scalar_prefetch = 0 : i64, scratch_operands = 0 : i64, tpu.core_type = #tpu.core_type<tc>} {
    %c0 = arith.constant 0 : index
    %c0_0 = arith.constant 0 : index
    %0 = vector.load %arg2[%c0, %c0_0] : memref<72x128xbf16, #tpu.memory_space<vmem>>, vector<32x128xbf16>
    %c32 = arith.constant 32 : index
    %c0_1 = arith.constant 0 : index
    %1 = vector.load %arg2[%c32, %c0_1] : memref<72x128xbf16, #tpu.memory_space<vmem>>, vector<32x128xbf16>
    %2 = arith.extf %1 : vector<32x128xbf16> to vector<32x128xf32>
    %c64 = arith.constant 64 : index
    %c0_2 = arith.constant 0 : index
    %3 = vector.load %arg2[%c64, %c0_2] : memref<72x128xbf16, #tpu.memory_space<vmem>>, vector<8x128xbf16>
    %4 = arith.extf %3 : vector<8x128xbf16> to vector<8x128xf32>
    %5 = vector.extract_strided_slice %4 {offsets = [0, 0], sizes = [1, 128], strides = [1, 1]} : vector<8x128xf32> to vector<1x128xf32>
    %6 = vector.extract_strided_slice %4 {offsets = [1, 0], sizes = [1, 128], strides = [1, 1]} : vector<8x128xf32> to vector<1x128xf32>
    %7 = vector.extract_strided_slice %4 {offsets = [2, 0], sizes = [1, 128], strides = [1, 1]} : vector<8x128xf32> to vector<1x128xf32>
    %8 = vector.extract_strided_slice %4 {offsets = [3, 0], sizes = [1, 128], strides = [1, 1]} : vector<8x128xf32> to vector<1x128xf32>
    %9 = vector.extract_strided_slice %4 {offsets = [4, 0], sizes = [1, 1], strides = [1, 1]} : vector<8x128xf32> to vector<1x1xf32>
    %c0_3 = arith.constant 0 : index
    %c0_4 = arith.constant 0 : index
    %10 = vector.load %arg1[%c0_3, %c0_4] : memref<32x32xbf16, #tpu.memory_space<vmem>>, vector<32x32xbf16>
    %cst = arith.constant dense<0.000000e+00> : vector<32x128xf32>
    %11 = tpu.matmul %10, %0, %cst {dimension_numbers = #tpu.dot_dimension_numbers<[1], [0], [0], [1], [0, 0, 1, 1], [], []>} : vector<32x32xbf16>, vector<32x128xbf16>, vector<32x128xf32> -> vector<32x128xf32>
    %12 = vector.broadcast %5 : vector<1x128xf32> to vector<32x128xf32>
    %13 = arith.addf %11, %12 : vector<32x128xf32>
    %14 = math.tanh %13 : vector<32x128xf32>
    %15 = tpu.iota {dimensions = array<i32: 0>} : vector<8x1xi32>
    %c4 = arith.constant 4 : index
    %16 = memref.load %arg0[%c4] : memref<5xi32, #tpu.memory_space<smem>>
    %17 = vector.broadcast %16 : i32 to vector<8x1xi32>
    %18 = arith.cmpi slt, %15, %17 : vector<8x1xi32>
    %19 = vector.extract_strided_slice %14 {offsets = [0, 0], sizes = [8, 128], strides = [1, 1]} : vector<32x128xf32> to vector<8x128xf32>
    %20 = vector.extract_strided_slice %14 {offsets = [8, 0], sizes = [8, 128], strides = [1, 1]} : vector<32x128xf32> to vector<8x128xf32>
    %c0_5 = arith.constant 0 : index
    %21 = memref.load %arg0[%c0_5] : memref<5xi32, #tpu.memory_space<smem>>
    %22 = vector.broadcast %21 : i32 to vector<8x1xi32>
    %23 = arith.cmpi slt, %15, %22 : vector<8x1xi32>
    %24 = arith.extui %23 : vector<8x1xi1> to vector<8x1xi32>
    %25 = arith.sitofp %24 : vector<8x1xi32> to vector<8x1xf32>
    %c2 = arith.constant 2 : index
    %26 = memref.load %arg0[%c2] : memref<5xi32, #tpu.memory_space<smem>>
    %27 = vector.broadcast %26 : i32 to vector<8x1xi32>
    %28 = arith.cmpi slt, %15, %27 : vector<8x1xi32>
    %29 = arith.extui %28 : vector<8x1xi1> to vector<8x1xi32>
    %30 = arith.sitofp %29 : vector<8x1xi32> to vector<8x1xf32>
    %31 = vector.broadcast %25 : vector<8x1xf32> to vector<8x128xf32>
    %32 = arith.mulf %19, %31 : vector<8x128xf32>
    %cst_6 = arith.constant dense<0.000000e+00> : vector<1xf32>
    %33 = vector.multi_reduction <add>, %30, %cst_6 [0] : vector<8x1xf32> to vector<1xf32>
    %34 = vector.shape_cast %33 : vector<1xf32> to vector<1x1xf32>
    %cst_7 = arith.constant dense<0.000000e+00> : vector<128xf32>
    %35 = vector.multi_reduction <add>, %20, %cst_7 [0] : vector<8x128xf32> to vector<128xf32>
    %36 = vector.shape_cast %35 : vector<128xf32> to vector<1x128xf32>
    %37 = tpu.reciprocal %34 {approx = true} : vector<1x1xf32> -> vector<1x1xf32>
    %38 = vector.broadcast %37 : vector<1x1xf32> to vector<1x128xf32>
    %39 = arith.mulf %36, %38 : vector<1x128xf32>
    %40 = arith.mulf %39, %8 : vector<1x128xf32>
    %cst_8 = arith.constant dense<0.000000e+00> : vector<1xf32>
    %41 = vector.multi_reduction <add>, %40, %cst_8 [1] : vector<1x128xf32> to vector<1xf32>
    %42 = vector.shape_cast %41 : vector<1xf32> to vector<1x1xf32>
    %43 = arith.addf %42, %9 : vector<1x1xf32>
    %44 = vector.broadcast %7 : vector<1x128xf32> to vector<8x128xf32>
    %45 = arith.mulf %32, %44 : vector<8x128xf32>
    %cst_9 = arith.constant dense<0.000000e+00> : vector<8xf32>
    %46 = vector.multi_reduction <add>, %45, %cst_9 [1] : vector<8x128xf32> to vector<8xf32>
    %47 = vector.shape_cast %46 : vector<8xf32> to vector<8x1xf32>
    %48 = vector.broadcast %43 : vector<1x1xf32> to vector<8x1xf32>
    %49 = arith.addf %47, %48 : vector<8x1xf32>
    %cst_10 = arith.constant -1.000000e+30 : f32
    %50 = vector.broadcast %cst_10 : f32 to vector<8x1xf32>
    %51 = arith.select %18, %49, %50 : vector<8x1xi1>, vector<8x1xf32>
    %cst_11 = arith.constant dense<0xFF800000> : vector<1xf32>
    %52 = vector.multi_reduction <maximumf>, %51, %cst_11 [0] : vector<8x1xf32> to vector<1xf32>
    %53 = vector.shape_cast %52 : vector<1xf32> to vector<1x1xf32>
    %54 = vector.broadcast %53 : vector<1x1xf32> to vector<8x1xf32>
    %55 = arith.subf %51, %54 : vector<8x1xf32>
    %56 = math.exp %55 : vector<8x1xf32>
    %cst_12 = arith.constant dense<0.000000e+00> : vector<1xf32>
    %57 = vector.multi_reduction <add>, %56, %cst_12 [0] : vector<8x1xf32> to vector<1xf32>
    %58 = vector.shape_cast %57 : vector<1xf32> to vector<1x1xf32>
    %59 = tpu.reciprocal %58 {approx = true} : vector<1x1xf32> -> vector<1x1xf32>
    %60 = vector.broadcast %59 : vector<1x1xf32> to vector<8x1xf32>
    %61 = arith.mulf %56, %60 : vector<8x1xf32>
    %62 = vector.broadcast %61 : vector<8x1xf32> to vector<8x128xf32>
    %63 = arith.mulf %32, %62 : vector<8x128xf32>
    %cst_13 = arith.constant dense<0.000000e+00> : vector<128xf32>
    %64 = vector.multi_reduction <add>, %63, %cst_13 [0] : vector<8x128xf32> to vector<128xf32>
    %65 = vector.shape_cast %64 : vector<128xf32> to vector<1x128xf32>
    %66 = vector.extract_strided_slice %14 {offsets = [16, 0], sizes = [8, 128], strides = [1, 1]} : vector<32x128xf32> to vector<8x128xf32>
    %67 = vector.extract_strided_slice %14 {offsets = [24, 0], sizes = [8, 128], strides = [1, 1]} : vector<32x128xf32> to vector<8x128xf32>
    %c1 = arith.constant 1 : index
    %68 = memref.load %arg0[%c1] : memref<5xi32, #tpu.memory_space<smem>>
    %69 = vector.broadcast %68 : i32 to vector<8x1xi32>
    %70 = arith.cmpi slt, %15, %69 : vector<8x1xi32>
    %71 = arith.extui %70 : vector<8x1xi1> to vector<8x1xi32>
    %72 = arith.sitofp %71 : vector<8x1xi32> to vector<8x1xf32>
    %c3 = arith.constant 3 : index
    %73 = memref.load %arg0[%c3] : memref<5xi32, #tpu.memory_space<smem>>
    %74 = vector.broadcast %73 : i32 to vector<8x1xi32>
    %75 = arith.cmpi slt, %15, %74 : vector<8x1xi32>
    %76 = arith.extui %75 : vector<8x1xi1> to vector<8x1xi32>
    %77 = arith.sitofp %76 : vector<8x1xi32> to vector<8x1xf32>
    %78 = vector.broadcast %72 : vector<8x1xf32> to vector<8x128xf32>
    %79 = arith.mulf %66, %78 : vector<8x128xf32>
    %cst_14 = arith.constant dense<0.000000e+00> : vector<1xf32>
    %80 = vector.multi_reduction <add>, %77, %cst_14 [0] : vector<8x1xf32> to vector<1xf32>
    %81 = vector.shape_cast %80 : vector<1xf32> to vector<1x1xf32>
    %cst_15 = arith.constant dense<0.000000e+00> : vector<128xf32>
    %82 = vector.multi_reduction <add>, %67, %cst_15 [0] : vector<8x128xf32> to vector<128xf32>
    %83 = vector.shape_cast %82 : vector<128xf32> to vector<1x128xf32>
    %84 = tpu.reciprocal %81 {approx = true} : vector<1x1xf32> -> vector<1x1xf32>
    %85 = vector.broadcast %84 : vector<1x1xf32> to vector<1x128xf32>
    %86 = arith.mulf %83, %85 : vector<1x128xf32>
    %87 = arith.mulf %86, %8 : vector<1x128xf32>
    %cst_16 = arith.constant dense<0.000000e+00> : vector<1xf32>
    %88 = vector.multi_reduction <add>, %87, %cst_16 [1] : vector<1x128xf32> to vector<1xf32>
    %89 = vector.shape_cast %88 : vector<1xf32> to vector<1x1xf32>
    %90 = arith.addf %89, %9 : vector<1x1xf32>
    %91 = vector.broadcast %7 : vector<1x128xf32> to vector<8x128xf32>
    %92 = arith.mulf %79, %91 : vector<8x128xf32>
    %cst_17 = arith.constant dense<0.000000e+00> : vector<8xf32>
    %93 = vector.multi_reduction <add>, %92, %cst_17 [1] : vector<8x128xf32> to vector<8xf32>
    %94 = vector.shape_cast %93 : vector<8xf32> to vector<8x1xf32>
    %95 = vector.broadcast %90 : vector<1x1xf32> to vector<8x1xf32>
    %96 = arith.addf %94, %95 : vector<8x1xf32>
    %cst_18 = arith.constant -1.000000e+30 : f32
    %97 = vector.broadcast %cst_18 : f32 to vector<8x1xf32>
    %98 = arith.select %18, %96, %97 : vector<8x1xi1>, vector<8x1xf32>
    %cst_19 = arith.constant dense<0xFF800000> : vector<1xf32>
    %99 = vector.multi_reduction <maximumf>, %98, %cst_19 [0] : vector<8x1xf32> to vector<1xf32>
    %100 = vector.shape_cast %99 : vector<1xf32> to vector<1x1xf32>
    %101 = vector.broadcast %100 : vector<1x1xf32> to vector<8x1xf32>
    %102 = arith.subf %98, %101 : vector<8x1xf32>
    %103 = math.exp %102 : vector<8x1xf32>
    %cst_20 = arith.constant dense<0.000000e+00> : vector<1xf32>
    %104 = vector.multi_reduction <add>, %103, %cst_20 [0] : vector<8x1xf32> to vector<1xf32>
    %105 = vector.shape_cast %104 : vector<1xf32> to vector<1x1xf32>
    %106 = tpu.reciprocal %105 {approx = true} : vector<1x1xf32> -> vector<1x1xf32>
    %107 = vector.broadcast %106 : vector<1x1xf32> to vector<8x1xf32>
    %108 = arith.mulf %103, %107 : vector<8x1xf32>
    %109 = vector.broadcast %108 : vector<8x1xf32> to vector<8x128xf32>
    %110 = arith.mulf %79, %109 : vector<8x128xf32>
    %cst_21 = arith.constant dense<0.000000e+00> : vector<128xf32>
    %111 = vector.multi_reduction <add>, %110, %cst_21 [0] : vector<8x128xf32> to vector<128xf32>
    %112 = vector.shape_cast %111 : vector<128xf32> to vector<1x128xf32>
    %113 = tpu.concatenate %65, %112 in 0 : vector<1x128xf32>, vector<1x128xf32> -> vector<2x128xf32>
    %114 = vector.extract_strided_slice %113 {offsets = [0, 0], sizes = [2, 32], strides = [1, 1]} : vector<2x128xf32> to vector<2x32xf32>
    %cst_22 = arith.constant dense<0.000000e+00> : vector<2x128xf32>
    %115 = tpu.matmul %114, %2, %cst_22 {dimension_numbers = #tpu.dot_dimension_numbers<[1], [0], [0], [1], [0, 0, 1, 1], [], []>} : vector<2x32xf32>, vector<32x128xf32>, vector<2x128xf32> -> vector<2x128xf32>
    %116 = vector.broadcast %6 : vector<1x128xf32> to vector<2x128xf32>
    %117 = arith.addf %115, %116 : vector<2x128xf32>
    %c0_23 = arith.constant 0 : index
    %c0_24 = arith.constant 0 : index
    %118 = vector.load %arg3[%c0_23, %c0_24] : memref<2x128xf32, #tpu.memory_space<vmem>>, vector<2x128xf32>
    tpu.vector_store %arg3[%c0_23, %c0_24], %117 {strides = array<i32>} : memref<2x128xf32, #tpu.memory_space<vmem>>, vector<2x128xf32>,
    return
  }
}

</mosaic_0001>

<bundles_post_ra>
// kernel: atae_bert_forward.1
= control target key start
LH: loop header
LB: loop body
LE: loop exit
PB: predicated region body
PF: predicated region fallthrough
CT: control target
= control target key end

     0   :  { %8 = vsyncpa [#allocation4], 0  ;;  %s612_s0 = inlined_call_operand.vmem [shape: s32[5], index: 0, kind: input, shape index: {}]   ;;  %s613_s1 = inlined_call_operand.vmem [shape: bf16[32,32], index: 1, kind: input, shape index: {}]   ;;  %s614_s2 = inlined_call_operand.vmem [shape: bf16[72,128], index: 2, kind: input, shape index: {}]   ;;  %s615_s3 = inlined_call_operand.hbm [shape: f32[2,128], index: 3, kind: output, shape index: {}]  }
   0x1   :  { %9 = vsyncpa [#allocation3], 0  ;;  %s16_s14 = sshll.u32 %s612_s0, 4  ;;  %s17_s14 = int_to_ptr.vmem [resolvable:$true] %s16_s14 }
   0x2   :  { %s473_s15 = scalar_lea.vmem %s17_s14, 16  ;;  %p478_p1 = scmp.lt.s32.totalorder %s17_s14, %s17_s14 }
   0x3   :  { %p474_p0 = scmp.ne.s32.totalorder %s17_s14, %s473_s15  ;;  %p479_p2 = scmp.lt.s32.totalorder %s473_s15, %s473_s15 }
   0x5   :  { %p480_p3 = por %p479_p2, %p478_p1 }
   0x7   :  { %p481_p4 = pnand %p480_p3, %p474_p0 }
   0x9   :  { %484 = shalt.err (!%p481_p4)
}
   0xa   :  { %s511_s16 = smov [#allocation2]  }
   0xb   :  { %19 = dma.vmem_to_smem %s17_s14, 16, %s511_s16, [#allocation4]  }
   0xc   :  { %507 = dma.done.wait [#allocation4], 16  }
   0xd   :  { %508 = vsyncadd [#allocation4], 4294967280 }
   0xe   :  { %27 = sfence }
   0xf   :  { %v449_v0 = vld [vmem:[%s614_s2] sm:$0xff]   ;;  %v450_v1 = vld [vmem:[%s614_s2 + $0x8] sm:$0xff]   ;;  %vm73_vm0 = vcmask 261120   ;;  %s394_s24 = sld [smem:[#allocation2 + $0x3]]  ;;  %s390_s25 = sld [smem:[#allocation2 + $0x2]]  ;;  %v47_v4 = vlaneseq  ;;  %v512_v8 = vmov 0.0  }
  0x10   :  { %416 = vmatprep.subr.bf16.mxu0 %v449_v0  ;;  %v451_v2 = vld [vmem:[%s613_s1] sm:$0xff]   ;;  %v452_v3 = vld [vmem:[%s613_s1 + $0x8] sm:$0xff]   ;;  %s138_s27 = sld [smem:[#allocation2]]  ;;  %s392_s28 = sld [smem:[#allocation2 + $0x1]]  ;;  %vm164_vm5 = vcmask 1043459   ;;  %vm185_vm7 = vcmask 7168  }
  0x11   :  { %417 = vmatpush3.bf16.msra.mxu0 %v449_v0  ;;  %420 = vmatprep.mubr.msk.bf16.mxu0 %vm73_vm0, %v451_v2  ;;  %v554_v6 = vshrl.u32 %v47_v4, 7  ;;  %v41_v11 = vld [vmem:[%s614_s2 + $0x20] sm:$0xf]  ;;  %s388_s29 = sld [smem:[#allocation2 + $0x4]]  ;;  %vm515_vm8 = vmmov 0   ;;  %vm287_vm9 = vcmask 1040384  }
  0x12   :  { %418 = vmatprep.subr.bf16.mxu0 %v450_v1  ;;  %v563_v14 = vunpack.c.l.bf16 %v41_v11  ;;  %432 = vmatprep.mubr.msk.f32.mxu1 %vm515_vm8, %v512_v8 }
  0x13   :  { %v49_v15 = vsub.s32 0, %v554_v6  ;;  %v174_v35 = vsub.s32 2, %v554_v6 }
  0x15   :  { %419 = vmatpush3.bf16.msra.mxu0 %v450_v1  ;;  %v223_v5 = vstv %s394_s24  ;;  %v144_v7 = vstv %s390_s25  ;;  %v50_v18 = vrot.slane %v563_v14, %v49_v15  ;;  %v175_v40 = vrot.slane %v563_v14, %v174_v35 }
  0x16   :  { %vm224_vm1 = vcmp.lt.s32.totalorder %v554_v6, %v223_v5  ;;  %vm145_vm2 = vcmp.lt.s32.totalorder %v554_v6, %v144_v7  ;;  %v139_v31 = vstv %s138_s27  ;;  %v218_v33 = vstv %s392_s28 }
  0x17   :  { %v395_v9 = vsel %vm224_vm1, 1.0, %v512_v8  ;;  %v391_v10 = vsel %vm145_vm2, 1.0, %v512_v8  ;;  %vm140_vm3 = vcmp.lt.s32.totalorder %v554_v6, %v139_v31  ;;  %vm219_vm4 = vcmp.lt.s32.totalorder %v554_v6, %v218_v33 }
  0x18   :  { %421 = vmatmul.mubr.msk.bf16.vlgmr.msra.gmra.mrb[0].mxu0 %vm73_vm0, %v452_v3  ;;  %v228_v12 = vrot.slane %v395_v9, 4  ;;  %v149_v13 = vrot.slane %v391_v10, 4  ;;  %v389_v37 = vsel %vm140_vm3, 1.0, %v512_v8  ;;  %v393_v42 = vsel %vm219_vm4, 1.0, %v512_v8 }
  0x19   :  { %v513_v5 = vmov 0   ;;  %v169_v7 = vrot.slane %v563_v14, 1  ;;  %v136_v11 = vstv %s388_s29 }
  0x1a   :  { %v229_v16 = vadd.f32 %v395_v9, %v228_v12  ;;  %v150_v17 = vadd.f32 %v391_v10, %v149_v13  ;;  %447 = vset.pattern.permute.xlu0 %v513_v5  ;;  %448 = vset.pattern.permute.xlu1 %v513_v5  ;;  %v181_v9 = vsub.s32 3, %v554_v6  ;;  %vm137_vm6 = vcmp.lt.s32.totalorder %v554_v6, %v136_v11 }
  0x1c   :  { %v230_v19 = vrot.slane %v229_v16, 2  ;;  %v151_v21 = vrot.slane %v150_v17, 2 }
  0x1e   :  { %v231_v28 = vadd.f32 %v230_v19, %v229_v16  ;;  %v152_v30 = vadd.f32 %v151_v21, %v150_v17 }
  0x20   :  { %v232_v32 = vrot.slane %v231_v28, 1  ;;  %v153_v34 = vrot.slane %v152_v30, 1 }
  0x22   :  { %v233_v36 = vadd.f32 %v232_v32, %v231_v28  ;;  %v154_v38 = vadd.f32 %v153_v34, %v152_v30 }
  0xeb   :  { %v422_v20 = vpop.f32.mrb[0].mxu0 }
  0xec   :  { %v123_v22 = vadd.f32 %v422_v20, %v50_v18  ;;  %v114_v23 = vpop.f32.mrb[1].mxu0 }
  0xed   :  { %v115_v24 = vadd.f32 %v114_v23, %v50_v18  ;;  %v423_v25 = vpop.f32.mrb[2].mxu0 }
  0xee   :  { %453 = vtanh.f32 %v123_v22  ;;  %v126_v26 = vadd.f32 %v423_v25, %v50_v18  ;;  %v117_v27 = vpop.f32.mrb[3].mxu0 }
  0xef   :  { %455 = vtanh.f32 %v115_v24  ;;  %v118_v29 = vadd.f32 %v117_v27, %v50_v18 }
  0xf0   :  { %457 = vtanh.f32 %v126_v26 }
  0xf1   :  { %459 = vtanh.f32 %v118_v29 }
  0xf2   :  { %461 = vrcp.f32 %v233_v36 }
  0xf3   :  { %463 = vrcp.f32 %v154_v38 }
  0xf8   :  { %v454_v39 = vpop.eup %453 }
  0xf9   :  { %v456_v41 = vpop.eup %455  ;;  %v576_v48 = vmul.f32 %v454_v39, %v393_v42 }
  0xfa   :  { %v458_v43 = vpop.eup %457  ;;  %v573_v44 = vmul.f32 %v456_v41, %v389_v37 }
  0xfb   :  { %v460_v45 = vpop.eup %459  ;;  %v234_v46 = vrot.slane %v458_v43, 4  ;;  %v247_v53 = vmul.f32 %v576_v48, %v175_v40 }
  0xfc   :  { %v176_v47 = vmul.f32 %v175_v40, %v573_v44  ;;  %v155_v49 = vrot.slane %v460_v45, 4  ;;  %v462_v58 = vpop.eup %461 }
  0xfd   :  { %v235_v50 = vadd.f32 %v458_v43, %v234_v46  ;;  %v464_v60 = vpop.eup %463 }
  0xfe   :  { %177 = vadd.xlane.f32.xlu1 %v176_v47  ;;  %v156_v51 = vadd.f32 %v460_v45, %v155_v49 }
  0xff   :  { %v236_v52 = vrot.slane %v235_v50, 2 }
 0x100   :  { %v157_v54 = vrot.slane %v156_v51, 2 }
 0x101   :  { %v237_v55 = vadd.f32 %v236_v52, %v235_v50 }
 0x102   :  { %248 = vadd.xlane.f32.xlu1 %v247_v53  ;;  %v158_v56 = vadd.f32 %v157_v54, %v156_v51 }
 0x103   :  { %v238_v57 = vrot.slane %v237_v55, 1 }
 0x104   :  { %v159_v59 = vrot.slane %v158_v56, 1 }
 0x105   :  { %v239_v61 = vadd.f32 %v238_v57, %v237_v55 }
 0x106   :  { %v160_v62 = vadd.f32 %v159_v59, %v158_v56 }
 0x107   :  { %v241_v0 = vmul.f32 %v462_v58, %v239_v61 }
 0x108   :  { %v162_v63 = vmul.f32 %v464_v60, %v160_v62 }
 0x109   :  { %v242_v3 = vmul.f32 %v241_v0, %v563_v14  ;;  %v514_v0 = vmov 0.0|0.0  }
 0x10a   :  { %v163_v1 = vmul.f32 %v162_v63, %v563_v14  ;;  %435 = vmatprep.subr.bf16.mxu1 %v514_v0 }
 0x10b   :  { %v243_v4 = vsel %vm164_vm5, %v242_v3, 0.0 }
 0x10c   :  { %v165_v2 = vsel %vm164_vm5, %v163_v1, 0.0  ;;  %v405_v1 = vld [vmem:[%s614_s2 + $0x10] sm:$0xff]  }
 0x10d   :  { %166 = vadd.xlane.f32.xlu0 %v165_v2  ;;  %437 = vmatpush3.bf16.msra.mxu1 %v405_v1  ;;  %v406_v2 = vld [vmem:[%s614_s2 + $0x18] sm:$0xff]   ;;  %s516_s2 = smov [#allocation5]  }
 0x10e   :  { %438 = vmatprep.subr.bf16.mxu1 %v514_v0  ;;  %s373_s7 = sshll.u32 %s516_s2, 4  ;;  %s374_s7 = int_to_ptr.vmem [resolvable:$true] %s373_s7 }
 0x10f   :  { %s485_s8 = scalar_lea.vmem %s374_s7, 32  ;;  %p490_p6 = scmp.lt.s32.totalorder %s374_s7, %s374_s7 }
 0x110   :  { %p486_p5 = scmp.ne.s32.totalorder %s374_s7, %s485_s8  ;;  %p491_p7 = scmp.lt.s32.totalorder %s485_s8, %s485_s8 }
 0x111   :  { %244 = vadd.xlane.f32.xlu0 %v243_v4  ;;  %440 = vmatpush3.bf16.msra.mxu1 %v406_v2 }
 0x112   :  { %p492_p8 = por %p491_p7, %p490_p6 }
 0x114   :  { %p493_p9 = pnand %p492_p8, %p486_p5 }
 0x18b   :  { %v178_v13 = vpop.xlane.xlu1 %177 }
 0x18f   :  { %v249_v21 = vpop.xlane.xlu1 %248 }
 0x19a   :  { %v167_v10 = vpop.xlane.xlu0 %166 }
 0x19b   :  { %v171_v12 = vadd.f32 %v169_v7, %v167_v10 }
 0x19d   :  { %v182_v15 = vrot.slane %v171_v12, %v181_v9 }
 0x19e   :  { %v245_v16 = vpop.xlane.xlu0 %244 }
 0x19f   :  { %v183_v17 = vadd.f32 %v182_v15, %v178_v13  ;;  %v246_v18 = vadd.f32 %v245_v16, %v169_v7 }
 0x1a1   :  { %v184_v19 = vsel %vm137_vm6, %v183_v17, -1e+30  ;;  %v253_v20 = vrot.slane %v246_v18, %v181_v9 }
 0x1a2   :  { %v186_v22 = vsel %vm185_vm7, %v184_v19, -inf }
 0x1a3   :  { %v187_v23 = vrot.slane %v186_v22, 4  ;;  %v254_v24 = vadd.f32 %v253_v20, %v249_v21 }
 0x1a5   :  { %v188_v25 = vmax.f32 %v186_v22, %v187_v23  ;;  %v255_v26 = vsel %vm137_vm6, %v254_v24, -1e+30 }
 0x1a6   :  { %v256_v27 = vsel %vm185_vm7, %v255_v26, -inf }
 0x1a7   :  { %v189_v28 = vrot.slane %v188_v25, 2  ;;  %v257_v29 = vrot.slane %v256_v27, 4 }
 0x1a9   :  { %v190_v30 = vmax.f32 %v188_v25, %v189_v28  ;;  %v258_v31 = vmax.f32 %v256_v27, %v257_v29 }
 0x1ab   :  { %v191_v32 = vrot.slane %v190_v30, 1  ;;  %v259_v33 = vrot.slane %v258_v31, 2 }
 0x1ad   :  { %v192_v34 = vmax.f32 %v190_v30, %v191_v32  ;;  %v260_v35 = vmax.f32 %v258_v31, %v259_v33 }
 0x1af   :  { %v193_v36 = vsub.f32 %v184_v19, %v192_v34  ;;  %v261_v37 = vrot.slane %v260_v35, 1 }
 0x1b1   :  { %v194_v38 = vmul.f32 1.442695, %v193_v36  ;;  %v262_v39 = vmax.f32 %v260_v35, %v261_v37 }
 0x1b3   :  { %465 = vpow2.f32 %v194_v38  ;;  %v263_v40 = vsub.f32 %v255_v26, %v262_v39 }
 0x1b5   :  { %v264_v41 = vmul.f32 1.442695, %v263_v40 }
 0x1b7   :  { %467 = vpow2.f32 %v264_v41 }
 0x1bd   :  { %v466_v42 = vpop.eup %465 }
 0x1be   :  { %v196_v43 = vsel %vm185_vm7, %v466_v42, 0.0 }
 0x1bf   :  { %v197_v45 = vrot.slane %v196_v43, 4 }
 0x1c1   :  { %v468_v46 = vpop.eup %467  ;;  %v198_v47 = vadd.f32 %v197_v45, %v196_v43 }
 0x1c2   :  { %v266_v49 = vsel %vm185_vm7, %v468_v46, 0.0 }
 0x1c3   :  { %v199_v50 = vrot.slane %v198_v47, 2  ;;  %v267_v51 = vrot.slane %v266_v49, 4 }
 0x1c5   :  { %v200_v52 = vadd.f32 %v199_v50, %v198_v47  ;;  %v268_v53 = vadd.f32 %v267_v51, %v266_v49 }
 0x1c7   :  { %v201_v54 = vrot.slane %v200_v52, 1  ;;  %v269_v55 = vrot.slane %v268_v53, 2 }
 0x1c9   :  { %v202_v56 = vadd.f32 %v201_v54, %v200_v52  ;;  %v270_v57 = vadd.f32 %v269_v55, %v268_v53 }
 0x1cb   :  { %469 = vrcp.f32 %v202_v56  ;;  %v271_v58 = vrot.slane %v270_v57, 1 }
 0x1cd   :  { %v272_v59 = vadd.f32 %v271_v58, %v270_v57 }
 0x1cf   :  { %471 = vrcp.f32 %v272_v59 }
 0x1d5   :  { %v470_v60 = vpop.eup %469 }
 0x1d6   :  { %v204_v61 = vmul.f32 %v470_v60, %v466_v42 }
 0x1d8   :  { %207 = vperm.xlu0 %447, %v204_v61  }
 0x1d9   :  { %v472_v62 = vpop.eup %471 }
 0x1da   :  { %v274_v63 = vmul.f32 %v472_v62, %v468_v46 }
 0x1dc   :  { %277 = vperm.xlu1 %448, %v274_v63  }
 0x257   :  { %v208_v3 = vpop.permute.xlu0 %207 }
 0x258   :  { %v210_v4 = vmul.f32 %v208_v3, %v573_v44  ;;  %v291_v44 = vsub.s32 1, %v554_v6 }
 0x25a   :  { %v211_v5 = vrot.slane %v210_v4, 4  ;;  %v292_v22 = vrot.slane %v563_v14, %v291_v44 }
 0x25b   :  { %v278_v7 = vpop.permute.xlu1 %277 }
 0x25c   :  { %v212_v9 = vadd.f32 %v211_v5, %v210_v4  ;;  %v280_v10 = vmul.f32 %v278_v7, %v576_v48 }
 0x25e   :  { %v213_v11 = vrot.slane %v212_v9, 2  ;;  %v281_v12 = vrot.slane %v280_v10, 4 }
 0x260   :  { %v214_v13 = vadd.f32 %v213_v11, %v212_v9  ;;  %v282_v15 = vadd.f32 %v281_v12, %v280_v10 }
 0x262   :  { %v283_v16 = vrot.slane %v282_v15, 2  ;;  %v215_v17 = vrot.slane %v214_v13, 1 }
 0x264   :  { %v284_v18 = vadd.f32 %v283_v16, %v282_v15  ;;  %v216_v20 = vadd.f32 %v215_v17, %v214_v13 }
 0x266   :  { %v285_v19 = vrot.slane %v284_v18, 1 }
 0x268   :  { %v286_v21 = vadd.f32 %v285_v19, %v284_v18 }
 0x26a   :  { %v288_v8 = vsel %vm287_vm9, %v216_v20, %v286_v21 }
 0x26b   :  { %433 = vmatmul.mubr.msk.f32.vlgmr.msra.gmra.mrb[0].mxu1 %vm73_vm0, %v288_v8 }
 0x33e   :  { %v362_v48 = vpop.f32.mrb[0].mxu1 }
 0x33f   :  { %v363_v23 = vadd.f32 %v362_v48, %v292_v22  ;;  %v434_v24 = vpop.f32.mrb[1].mxu1 }
 0x341   :  { %366 = vst [vmem:[#allocation5] sm:$0x3] %v363_v23 }
 0x342   :  { %496 = shalt.err (!%p493_p9)
}
 0x343   :  { %s497_s11 = scalar_lea.hbm %s615_s3, 32 }
 0x344   :  { %p498_p10 = scmp.ne.s32.totalorder %s615_s3, %s497_s11  ;;  %p501_p11 = scmp.lt.u32.totalorder %s497_s11, %s615_s3 }
 0x346   :  { %p503_p12 = pnand %p501_p11, %p498_p10 }
 0x348   :  { %506 = shalt.err (!%p503_p12)
}
 0x349   :  { %376 = dma.vmem_to_hbm [thread:$0]  %s374_s7, 32, %s615_s3, [#allocation3]  }
 0x34a   :  { %509 = dma.done.wait [#allocation3], 32  }
 0x34b   :  { %510 = vsyncadd [#allocation3], 4294967264 }
 0x34c   :  { %380 = vsyncpa [#allocation3], 1 }
 0x34d   :  { %381 = vsyncpa [#allocation4], 1 }

</bundles_post_ra>
